<compile_context>
chip_gen: v7x
topology: tpu7x:2x2x1
jax: 0.10.0
libtpu: 0.0.40
codegen_flags: <defaults>
</compile_context>

<pallas_src>
import functools

import jax
import jax.numpy as jnp
from jax.experimental import pallas as pl
from jax.experimental.pallas import tpu as pltpu


def _round_up(x, m):
    return (x + m - 1) // m * m


def _vmem_budget():
    """Return (streaming budget, vmem_limit_bytes) from physical VMEM."""
    phys = None
    try:
        info = pltpu.get_tpu_info()
        phys = int(getattr(info, "vmem_capacity_bytes", 0)) or None
    except Exception:
        phys = None
    if phys is None:
        phys = 64 * 1024 * 1024          # conservative default (v7x physical)
    budget = max(8 << 20, int(phys * 0.45))            # ~57 MiB v5e/v6e, ~29 MiB v7x
    limit = max(32 << 20, min(int(phys * 0.75), 100 << 20))
    return budget, limit


def _choose_tiling(B, C, HW, itemsize, budget, max_tile_hw):
    """Pick (n_cblk, c_blk, lane_tile) for the streamed passes."""
    hw_ceil = _round_up(HW, 128)
    max_tile = max(128, min(_round_up(max_tile_hw, 128), hw_ceil))

    # Channel-split candidates.  Prefer 2 (engages both TensorCores on
    # multi-core chips and halves the per-step footprint so the lane tile can
    # double), then no split, then finer splits only if needed for the budget.
    cands = []
    if C % 2 == 0 and (C // 2) % 8 == 0:
        cands.append(2)
    cands.append(1)
    for n in (4, 8, 16, 32, 64):
        if C % n == 0 and (C // n) % 8 == 0 and n not in cands:
            cands.append(n)

    fallback = None
    for n_cblk in cands:
        c_blk = C // n_cblk
        # Per grid step: 2 streamed arrays x 2 pipeline buffers
        # (reduce pass: x_high + x_low; gate pass: x_low in + out).
        # The (B, Cblk, 1) accumulator / gate are negligible.
        per_lane = 4 * B * c_blk * itemsize
        t_fit = (budget // per_lane) // 128 * 128
        if t_fit >= 128:
            return n_cblk, c_blk, int(min(max_tile, t_fit))
        if fallback is None or c_blk < fallback[1]:
            fallback = (n_cblk, c_blk)
    # TODO(synk): extremely large B*C would additionally need batch tiling;
    # fall back to the finest channel split at the minimum lane tile.
    return fallback[0], fallback[1], 128


# ---------------------------------------------------------------------------
# Fused fast path (small problems): pool + MLP + gate in one kernel.
# ---------------------------------------------------------------------------
def _fused_kernel(xh_ref, xl_ref, w1_ref, b1_ref, w2_ref, b2_ref, out_ref, *,
                  inv_hw):
    # Block shapes equal the full logical arrays, so reductions are exact
    # (Mosaic masks the physical lane padding) — no explicit masking needed.
    y = (jnp.sum(xh_ref[...].astype(jnp.float32), axis=-1) +
         jnp.sum(xl_ref[...].astype(jnp.float32), axis=-1)) * inv_hw   # (B, C)
    h = jnp.dot(y, w1_ref[...], preferred_element_type=jnp.float32) + b1_ref[...]
    h = jnp.maximum(h, 0.0)
    s = jnp.dot(h, w2_ref[...], preferred_element_type=jnp.float32) + b2_ref[...]
    s = jax.nn.sigmoid(s)                                               # (B, C)
    out_ref[...] = (xl_ref[...].astype(jnp.float32) * s[:, :, None]
                    ).astype(out_ref.dtype)


# ---------------------------------------------------------------------------
# Pass 1: streamed pooled mean of (x_high + x_low), channel-block parallel.
# ---------------------------------------------------------------------------
def _pool_mean_kernel(xh_ref, xl_ref, y_ref, *, hw, tile, ragged):
    t = pl.program_id(1)

    @pl.when(t == 0)
    def _():
        y_ref[...] = jnp.zeros_like(y_ref)

    x = xh_ref[...].astype(jnp.float32) + xl_ref[...].astype(jnp.float32)
    if ragged:
        # Boundary-block padding contents are unspecified -> mask lanes >= HW
        # so the pooled sum stays unbiased (no wrapper-side jnp.pad).
        lane = jax.lax.broadcasted_iota(jnp.int32, x.shape, 2)
        x = jnp.where(t * tile + lane < hw, x, 0.0)

    # Per-tile cross-lane reduce: XLU work that hides under the DMA stream and
    # keeps the resident accumulator at (B, Cblk, 1) instead of (B, C, tile).
    y_ref[...] += jnp.sum(x, axis=-1, keepdims=True)

    @pl.when(t == pl.num_programs(1) - 1)
    def _():
        y_ref[...] *= (1.0 / hw)


# ---------------------------------------------------------------------------
# Tiny MLP + sigmoid on the pooled means (needs all channels, so it is
# hoisted out of the channel-parallel reduce; single microscopic grid point).
# ---------------------------------------------------------------------------
def _mlp_kernel(y_ref, w1_ref, b1_ref, w2_ref, b2_ref, s_ref):
    h = jnp.dot(y_ref[...], w1_ref[...], preferred_element_type=jnp.float32) + b1_ref[...]
    h = jnp.maximum(h, 0.0)
    s = jnp.dot(h, w2_ref[...], preferred_element_type=jnp.float32) + b2_ref[...]
    s_ref[...] = jax.nn.sigmoid(s)


# ---------------------------------------------------------------------------
# Pass 2: channel gating of x_low, fully parallel over lane-dense tiles.
# ---------------------------------------------------------------------------
def _gate_kernel(s_ref, xl_ref, out_ref):
    # Multiply in the output/input dtype: exact for f32; keeps bf16 streams
    # in bf16 on v6e/v7x (Mosaic upcasts internally on v5e).
    out_ref[...] = xl_ref[...] * s_ref[...].astype(out_ref.dtype)


# ---------------------------------------------------------------------------
# Wrapper
# ---------------------------------------------------------------------------
def cfem_forward(x_high, x_low, w1, b1, w2, b2, *,
                 max_tile_hw=8192, force_two_pass=False):
    """CFEM forward.  x_high/x_low: NCHW arrays of identical shape.

    w1: (C, C//2), b1: (C//2,), w2: (C//2, C), b2: (C,) — weights are the
    TRANSPOSE of PyTorch nn.Linear's (out, in) storage, so kernels compute
    y @ w1 / h @ w2 directly.
    """
    B, C, H, W = x_high.shape
    assert x_low.shape == x_high.shape
    HW = H * W
    Cm = w1.shape[1]
    dtype = x_low.dtype
    itemsize = jnp.dtype(dtype).itemsize

    budget, vmem_limit = _vmem_budget()

    xh = x_high.reshape(B, C, HW)
    xl = x_low.reshape(B, C, HW)
    b1_2d = b1.reshape(1, Cm)
    b2_2d = b2.reshape(1, C)

    hw_ceil = _round_up(HW, 128)

    # -- Fused single-call fast path for small feature maps ----------------
    # (conservative footprint: inputs/output x2 pipeline buffers + f32 temps)
    fused_bytes = B * C * hw_ceil * (6 * itemsize + 8) + 4 * C * Cm * 4
    if (not force_two_pass) and fused_bytes <= min(budget, 24 << 20):
        out = pl.pallas_call(
            functools.partial(_fused_kernel, inv_hw=1.0 / HW),
            out_shape=jax.ShapeDtypeStruct((B, C, HW), dtype),
            grid=(1,),
            in_specs=[
                pl.BlockSpec((B, C, HW), lambda i: (0, 0, 0)),
                pl.BlockSpec((B, C, HW), lambda i: (0, 0, 0)),
                pl.BlockSpec((C, Cm), lambda i: (0, 0)),
                pl.BlockSpec((1, Cm), lambda i: (0, 0)),
                pl.BlockSpec((Cm, C), lambda i: (0, 0)),
                pl.BlockSpec((1, C), lambda i: (0, 0)),
            ],
            out_specs=pl.BlockSpec((B, C, HW), lambda i: (0, 0, 0)),
            compiler_params=pltpu.CompilerParams(
                dimension_semantics=("arbitrary",),
                vmem_limit_bytes=vmem_limit),
        )(xh, xl, w1, b1_2d, w2, b2_2d)
        return out.reshape(B, C, H, W)

    # -- Tiled streaming path ----------------------------------------------
    n_cblk, c_blk, tile = _choose_tiling(B, C, HW, itemsize, budget, max_tile_hw)
    n_tiles = pl.cdiv(HW, tile)
    ragged = (HW % tile) != 0

    # Pass 1: pooled mean of (x_high + x_low); channel blocks in parallel
    # (engages both TensorCores on v7x), HW tiles serial reduction.
    y = pl.pallas_call(
        functools.partial(_pool_mean_kernel, hw=HW, tile=tile, ragged=ragged),
        out_shape=jax.ShapeDtypeStruct((B, C, 1), jnp.float32),
        grid=(n_cblk, n_tiles),
        in_specs=[
            pl.BlockSpec((B, c_blk, tile), lambda c, t: (0, c, t)),
            pl.BlockSpec((B, c_blk, tile), lambda c, t: (0, c, t)),
        ],
        out_specs=pl.BlockSpec((B, c_blk, 1), lambda c, t: (0, c, 0)),
        compiler_params=pltpu.CompilerParams(
            dimension_semantics=("parallel", "arbitrary"),
            vmem_limit_bytes=vmem_limit),
    )(xh, xl)

    # Tiny MLP + sigmoid -> per-channel gate s (B, C).
    s = pl.pallas_call(
        _mlp_kernel,
        out_shape=jax.ShapeDtypeStruct((B, C), jnp.float32),
        grid=(1,),
        in_specs=[
            pl.BlockSpec((B, C), lambda i: (0, 0)),
            pl.BlockSpec((C, Cm), lambda i: (0, 0)),
            pl.BlockSpec((1, Cm), lambda i: (0, 0)),
            pl.BlockSpec((Cm, C), lambda i: (0, 0)),
            pl.BlockSpec((1, C), lambda i: (0, 0)),
        ],
        out_specs=pl.BlockSpec((B, C), lambda i: (0, 0)),
        compiler_params=pltpu.CompilerParams(
            dimension_semantics=("arbitrary",),
            vmem_limit_bytes=vmem_limit),
    )(y.reshape(B, C), w1, b1_2d, w2, b2_2d)

    # Pass 2: gate x_low; fully parallel.  The ragged last output block is
    # clipped by Pallas on writeback (no wrapper-side slice needed).
    out = pl.pallas_call(
        _gate_kernel,
        out_shape=jax.ShapeDtypeStruct((B, C, HW), dtype),
        grid=(n_cblk, n_tiles),
        in_specs=[
            pl.BlockSpec((B, c_blk, 1), lambda c, t: (0, c, 0)),     # resident gate
            pl.BlockSpec((B, c_blk, tile), lambda c, t: (0, c, t)),
        ],
        out_specs=pl.BlockSpec((B, c_blk, tile), lambda c, t: (0, c, t)),
        compiler_params=pltpu.CompilerParams(
            dimension_semantics=("parallel", "parallel"),
            vmem_limit_bytes=vmem_limit),
    )(s.reshape(B, C, 1), xl)

    return out.reshape(B, C, H, W)


def cfem_reference(x_high, x_low, w1, b1, w2, b2):
    """Pure-JAX reference matching the PyTorch forward."""
    x_mix = x_high + x_low
    y = jnp.mean(x_mix, axis=(2, 3))                       # (B, C)
    h = jnp.maximum(y @ w1 + b1, 0.0)                      # (B, C//2)
    s = jax.nn.sigmoid(h @ w2 + b2)                        # (B, C)
    return x_low * s[:, :, None, None]


if __name__ == "__main__":
    key = jax.random.PRNGKey(0)
    keys = jax.random.split(key, 12)

    # Small shapes consistent with the module: batch=2, in_channels=8, 16x16.
    B, C, H, W = 2, 8, 16, 16
    Cm = C // 2

    x_high = jax.random.normal(keys[0], (B, C, H, W), dtype=jnp.float32)
    x_low = jax.random.normal(keys[1], (B, C, H, W), dtype=jnp.float32)
    w1 = 0.1 * jax.random.normal(keys[2], (C, Cm), dtype=jnp.float32)
    b1 = 0.1 * jax.random.normal(keys[3], (Cm,), dtype=jnp.float32)
    w2 = 0.1 * jax.random.normal(keys[4], (Cm, C), dtype=jnp.float32)
    b2 = 0.1 * jax.random.normal(keys[5], (C,), dtype=jnp.float32)

    ref = cfem_reference(x_high, x_low, w1, b1, w2, b2)

    # 1) Fused single-kernel fast path.
    out = jax.block_until_ready(cfem_forward(x_high, x_low, w1, b1, w2, b2))
    assert out.shape == (B, C, H, W)
    assert jnp.allclose(out, ref, atol=1e-5, rtol=1e-5), "mismatch (fused)"

    # 2) Forced tiled path: multi-tile streamed reduce + MLP + parallel gate.
    out2 = jax.block_until_ready(
        cfem_forward(x_high, x_low, w1, b1, w2, b2,
                     force_two_pass=True, max_tile_hw=128))
    assert jnp.allclose(out2, ref, atol=1e-5, rtol=1e-5), "mismatch (tiled)"

    # 3) Spatial size not a multiple of 128 (fused path, exact logical shape).
    H3, W3 = 9, 14
    xh3 = jax.random.normal(keys[6], (B, C, H3, W3), dtype=jnp.float32)
    xl3 = jax.random.normal(keys[7], (B, C, H3, W3), dtype=jnp.float32)
    ref3 = cfem_reference(xh3, xl3, w1, b1, w2, b2)
    out3 = jax.block_until_ready(cfem_forward(xh3, xl3, w1, b1, w2, b2))
    assert jnp.allclose(out3, ref3, atol=1e-5, rtol=1e-5), "mismatch (nonaligned fused)"

    # 4) Non-aligned HW on the tiled path: ragged last tile is masked in the
    #    reduce and clipped on the gate writeback (no wrapper pad/slice).
    H4, W4 = 9, 30    # HW = 270 -> 2 full 128-lane tiles + 1 ragged (14 lanes)
    xh4 = jax.random.normal(keys[8], (B, C, H4, W4), dtype=jnp.float32)
    xl4 = jax.random.normal(keys[9], (B, C, H4, W4), dtype=jnp.float32)
    ref4 = cfem_reference(xh4, xl4, w1, b1, w2, b2)
    out4 = jax.block_until_ready(
        cfem_forward(xh4, xl4, w1, b1, w2, b2,
                     force_two_pass=True, max_tile_hw=128))
    assert jnp.allclose(out4, ref4, atol=1e-5, rtol=1e-5), "mismatch (ragged tiled)"

    # 5) Channel count allowing the channel-parallel split (2 blocks of 8).
    C5, Cm5 = 16, 8
    xh5 = jax.random.normal(keys[10], (B, C5, H, W), dtype=jnp.float32)
    xl5 = jax.random.normal(keys[11], (B, C5, H, W), dtype=jnp.float32)
    w1_5 = 0.1 * jax.random.normal(keys[2], (C5, Cm5), dtype=jnp.float32)
    b1_5 = 0.1 * jax.random.normal(keys[3], (Cm5,), dtype=jnp.float32)
    w2_5 = 0.1 * jax.random.normal(keys[4], (Cm5, C5), dtype=jnp.float32)
    b2_5 = 0.1 * jax.random.normal(keys[5], (C5,), dtype=jnp.float32)
    ref5 = cfem_reference(xh5, xl5, w1_5, b1_5, w2_5, b2_5)
    out5 = jax.block_until_ready(
        cfem_forward(xh5, xl5, w1_5, b1_5, w2_5, b2_5,
                     force_two_pass=True, max_tile_hw=128))
    assert jnp.allclose(out5, ref5, atol=1e-5, rtol=1e-5), "mismatch (channel split)"

    print("KERNEL_OK")
</pallas_src>

<mosaic_0001>
module attributes {stable_mosaic.version = 11 : i64} {
  func.func @_fused_kernel(%arg0: i32, %arg1: memref<2x8x256xf32, #tpu.memory_space<vmem>>, %arg2: memref<2x8x256xf32, #tpu.memory_space<vmem>>, %arg3: memref<8x4xf32, #tpu.memory_space<vmem>>, %arg4: memref<1x4xf32, #tpu.memory_space<vmem>>, %arg5: memref<4x8xf32, #tpu.memory_space<vmem>>, %arg6: memref<1x8xf32, #tpu.memory_space<vmem>>, %arg7: memref<2x8x256xf32, #tpu.memory_space<vmem>>) attributes {dimension_semantics = [#tpu.dimension_semantics<arbitrary>], iteration_bounds = array<i64: 1>, scalar_prefetch = 0 : i64, scratch_operands = 0 : i64, tpu.core_type = #tpu.core_type<tc>, window_params = [{pipeline_mode = #tpu.pipeline_mode<synchronous>, transform_indices = @transform_0, window_bounds = array<i64: 2, 8, 256>}, {pipeline_mode = #tpu.pipeline_mode<synchronous>, transform_indices = @transform_1, window_bounds = array<i64: 2, 8, 256>}, {pipeline_mode = #tpu.pipeline_mode<synchronous>, transform_indices = @transform_2, window_bounds = array<i64: 8, 4>}, {pipeline_mode = #tpu.pipeline_mode<synchronous>, transform_indices = @transform_3, window_bounds = array<i64: 1, 4>}, {pipeline_mode = #tpu.pipeline_mode<synchronous>, transform_indices = @transform_4, window_bounds = array<i64: 4, 8>}, {pipeline_mode = #tpu.pipeline_mode<synchronous>, transform_indices = @transform_5, window_bounds = array<i64: 1, 8>}, {pipeline_mode = #tpu.pipeline_mode<synchronous>, transform_indices = @transform_6, window_bounds = array<i64: 2, 8, 256>}]} {
    %c0 = arith.constant 0 : index
    %c0_0 = arith.constant 0 : index
    %c0_1 = arith.constant 0 : index
    %0 = vector.load %arg1[%c0, %c0_0, %c0_1] : memref<2x8x256xf32, #tpu.memory_space<vmem>>, vector<2x8x256xf32>
    %cst = arith.constant dense<0.000000e+00> : vector<2x8xf32>
    %1 = vector.multi_reduction <add>, %0, %cst [2] : vector<2x8x256xf32> to vector<2x8xf32>
    %c0_2 = arith.constant 0 : index
    %c0_3 = arith.constant 0 : index
    %c0_4 = arith.constant 0 : index
    %2 = vector.load %arg2[%c0_2, %c0_3, %c0_4] : memref<2x8x256xf32, #tpu.memory_space<vmem>>, vector<2x8x256xf32>
    %cst_5 = arith.constant dense<0.000000e+00> : vector<2x8xf32>
    %3 = vector.multi_reduction <add>, %2, %cst_5 [2] : vector<2x8x256xf32> to vector<2x8xf32>
    %4 = arith.addf %1, %3 : vector<2x8xf32>
    %cst_6 = arith.constant 3.906250e-03 : f32
    %5 = vector.broadcast %cst_6 : f32 to vector<2x8xf32>
    %6 = arith.mulf %4, %5 : vector<2x8xf32>
    %c0_7 = arith.constant 0 : index
    %c0_8 = arith.constant 0 : index
    %7 = vector.load %arg3[%c0_7, %c0_8] : memref<8x4xf32, #tpu.memory_space<vmem>>, vector<8x4xf32>
    %cst_9 = arith.constant dense<0.000000e+00> : vector<2x4xf32>
    %8 = tpu.matmul %6, %7, %cst_9 {dimension_numbers = #tpu.dot_dimension_numbers<[1], [0], [0], [1], [0, 0, 1, 1], [], []>} : vector<2x8xf32>, vector<8x4xf32>, vector<2x4xf32> -> vector<2x4xf32>
    %c0_10 = arith.constant 0 : index
    %c0_11 = arith.constant 0 : index
    %9 = vector.load %arg4[%c0_10, %c0_11] : memref<1x4xf32, #tpu.memory_space<vmem>>, vector<1x4xf32>
    %10 = vector.broadcast %9 : vector<1x4xf32> to vector<2x4xf32>
    %11 = arith.addf %8, %10 : vector<2x4xf32>
    %cst_12 = arith.constant 0.000000e+00 : f32
    %12 = vector.broadcast %cst_12 : f32 to vector<2x4xf32>
    %13 = arith.maximumf %11, %12 : vector<2x4xf32>
    %c0_13 = arith.constant 0 : index
    %c0_14 = arith.constant 0 : index
    %14 = vector.load %arg5[%c0_13, %c0_14] : memref<4x8xf32, #tpu.memory_space<vmem>>, vector<4x8xf32>
    %cst_15 = arith.constant dense<0.000000e+00> : vector<2x8xf32>
    %15 = tpu.matmul %13, %14, %cst_15 {dimension_numbers = #tpu.dot_dimension_numbers<[1], [0], [0], [1], [0, 0, 1, 1], [], []>} : vector<2x4xf32>, vector<4x8xf32>, vector<2x8xf32> -> vector<2x8xf32>
    %c0_16 = arith.constant 0 : index
    %c0_17 = arith.constant 0 : index
    %16 = vector.load %arg6[%c0_16, %c0_17] : memref<1x8xf32, #tpu.memory_space<vmem>>, vector<1x8xf32>
    %17 = vector.broadcast %16 : vector<1x8xf32> to vector<2x8xf32>
    %18 = arith.addf %15, %17 : vector<2x8xf32>
    %19 = arith.negf %18 : vector<2x8xf32>
    %20 = math.exp %19 : vector<2x8xf32>
    %cst_18 = arith.constant 1.000000e+00 : f32
    %21 = vector.broadcast %cst_18 : f32 to vector<2x8xf32>
    %22 = arith.addf %21, %20 : vector<2x8xf32>
    %23 = arith.divf %21, %22 : vector<2x8xf32>
    %c0_19 = arith.constant 0 : index
    %c0_20 = arith.constant 0 : index
    %c0_21 = arith.constant 0 : index
    %24 = vector.load %arg2[%c0_19, %c0_20, %c0_21] : memref<2x8x256xf32, #tpu.memory_space<vmem>>, vector<2x8x256xf32>
    %25 = vector.shape_cast %23 : vector<2x8xf32> to vector<2x8x1xf32>
    %26 = vector.broadcast %25 : vector<2x8x1xf32> to vector<2x8x256xf32>
    %27 = arith.mulf %24, %26 : vector<2x8x256xf32>
    %c0_22 = arith.constant 0 : index
    %c0_23 = arith.constant 0 : index
    %c0_24 = arith.constant 0 : index
    %28 = vector.load %arg7[%c0_22, %c0_23, %c0_24] : memref<2x8x256xf32, #tpu.memory_space<vmem>>, vector<2x8x256xf32>
    tpu.vector_store %arg7[%c0_22, %c0_23, %c0_24], %27 {strides = array<i32>} : memref<2x8x256xf32, #tpu.memory_space<vmem>>, vector<2x8x256xf32>,
    return
  }
  func.func @transform_0(%arg0: i32) -> (i32, i32, i32) {
    %c0_i32 = arith.constant 0 : i32
    %c0_i32_0 = arith.constant 0 : i32
    %c0_i32_1 = arith.constant 0 : i32
    %c0_i32_2 = arith.constant 0 : i32
    return %c0_i32, %c0_i32_0, %c0_i32_1 : i32, i32, i32
  }
  func.func @transform_1(%arg0: i32) -> (i32, i32, i32) {
    %c0_i32 = arith.constant 0 : i32
    %c0_i32_0 = arith.constant 0 : i32
    %c0_i32_1 = arith.constant 0 : i32
    %c0_i32_2 = arith.constant 0 : i32
    return %c0_i32, %c0_i32_0, %c0_i32_1 : i32, i32, i32
  }
  func.func @transform_2(%arg0: i32) -> (i32, i32) {
    %c0_i32 = arith.constant 0 : i32
    %c0_i32_0 = arith.constant 0 : i32
    %c0_i32_1 = arith.constant 0 : i32
    return %c0_i32, %c0_i32_0 : i32, i32
  }
  func.func @transform_3(%arg0: i32) -> (i32, i32) {
    %c0_i32 = arith.constant 0 : i32
    %c0_i32_0 = arith.constant 0 : i32
    %c0_i32_1 = arith.constant 0 : i32
    return %c0_i32, %c0_i32_0 : i32, i32
  }
  func.func @transform_4(%arg0: i32) -> (i32, i32) {
    %c0_i32 = arith.constant 0 : i32
    %c0_i32_0 = arith.constant 0 : i32
    %c0_i32_1 = arith.constant 0 : i32
    return %c0_i32, %c0_i32_0 : i32, i32
  }
  func.func @transform_5(%arg0: i32) -> (i32, i32) {
    %c0_i32 = arith.constant 0 : i32
    %c0_i32_0 = arith.constant 0 : i32
    %c0_i32_1 = arith.constant 0 : i32
    return %c0_i32, %c0_i32_0 : i32, i32
  }
  func.func @transform_6(%arg0: i32) -> (i32, i32, i32) {
    %c0_i32 = arith.constant 0 : i32
    %c0_i32_0 = arith.constant 0 : i32
    %c0_i32_1 = arith.constant 0 : i32
    %c0_i32_2 = arith.constant 0 : i32
    return %c0_i32, %c0_i32_0, %c0_i32_1 : i32, i32, i32
  }
}

</mosaic_0001>

<bundles_post_ra>
// kernel: tpu_custom_call.1
= control target key start
LH: loop header
LB: loop body
LE: loop exit
PB: predicated region body
PF: predicated region fallthrough
CT: control target
= control target key end

     0   :  { %11 = vsyncpa [#allocation3], 0  ;;  %s522_s0 = inlined_call_operand.hbm [shape: f32[2,8,256], index: 0, kind: input, shape index: {}]   ;;  %s523_s1 = inlined_call_operand.hbm [shape: f32[2,8,256], index: 1, kind: input, shape index: {}]   ;;  %s524_s2 = inlined_call_operand.vmem [shape: f32[8,4], index: 2, kind: input, shape index: {}]   ;;  %s525_s3 = inlined_call_operand.vmem [shape: f32[1,4], index: 3, kind: input, shape index: {}]   ;;  %s526_s4 = inlined_call_operand.vmem [shape: f32[4,8], index: 4, kind: input, shape index: {}]   ;;  %s527_s5 = inlined_call_operand.vmem [shape: f32[1,8], index: 5, kind: input, shape index: {}]   ;;  %s528_s6 = inlined_call_operand.hbm [shape: f32[2,8,256], index: 6, kind: output, shape index: {}]  }
   0x1   :  { %12 = vsyncpa [#allocation6], 0 }
   0x2   :  { %13 = vsyncpa [#allocation4], 0  ;;  %s407_s21 = smov [#allocation2]   ;;  %s335_s25 = scalar_lea.hbm %s522_s0, 512 }
   0x3   :  { %s19_s22 = sshll.u32 %s407_s21, 4  ;;  %p336_p0 = scmp.ne.s32.totalorder %s522_s0, %s335_s25  ;;  %s20_s22 = int_to_ptr.vmem [resolvable:$true] %s19_s22 }
   0x4   :  { %p339_p1 = scmp.lt.u32.totalorder %s335_s25, %s522_s0 }
   0x6   :  { %p341_p2 = pnand %p339_p1, %p336_p0 }
   0x8   :  { %344 = shalt.err (!%p341_p2)
}
   0x9   :  { %s345_s30 = scalar_lea.vmem %s20_s22, 512  ;;  %p350_p4 = scmp.lt.s32.totalorder %s20_s22, %s20_s22 }
   0xa   :  { %p346_p3 = scmp.ne.s32.totalorder %s20_s22, %s345_s30  ;;  %p351_p5 = scmp.lt.s32.totalorder %s345_s30, %s345_s30 }
   0xc   :  { %p352_p6 = por %p351_p5, %p350_p4 }
   0xe   :  { %p353_p7 = pnand %p352_p6, %p346_p3 }
  0x10   :  { %356 = shalt.err (!%p353_p7)
}
  0x11   :  { %s408_s7 = smov 256   ;;  %s409_s8 = smov 16  }
  0x12   :  { %25 = dma.hbm_to_vmem [thread:$0]  %s522_s0, 512, %s20_s22, [#allocation3], %s408_s7, %s408_s7, %s409_s8  }
  0x13   :  { %s410_s11 = smov [#allocation5]   ;;  %s357_s15 = scalar_lea.hbm %s523_s1, 512 }
  0x14   :  { %s31_s12 = sshll.u32 %s410_s11, 4  ;;  %p358_p8 = scmp.ne.s32.totalorder %s523_s1, %s357_s15  ;;  %s32_s12 = int_to_ptr.vmem [resolvable:$true] %s31_s12 }
  0x15   :  { %p361_p9 = scmp.lt.u32.totalorder %s357_s15, %s523_s1 }
  0x17   :  { %p363_p10 = pnand %p361_p9, %p358_p8 }
  0x19   :  { %366 = shalt.err (!%p363_p10)
}
  0x1a   :  { %s367_s20 = scalar_lea.vmem %s32_s12, 512  ;;  %p372_p12 = scmp.lt.s32.totalorder %s32_s12, %s32_s12 }
  0x1b   :  { %p368_p11 = scmp.ne.s32.totalorder %s32_s12, %s367_s20  ;;  %p373_p13 = scmp.lt.s32.totalorder %s367_s20, %s367_s20 }
  0x1d   :  { %p374_p0 = por %p373_p13, %p372_p12 }
  0x1f   :  { %p375_p1 = pnand %p374_p0, %p368_p11 }
  0x21   :  { %378 = shalt.err (!%p375_p1)
}
  0x22   :  { %37 = dma.hbm_to_vmem [thread:$0]  %s523_s1, 512, %s32_s12, [#allocation6], %s408_s7, %s408_s7, %s409_s8  }
  0x23   :  { %401 = dma.done.wait [#allocation3], 512  }
  0x24   :  { %402 = vsyncadd [#allocation3], 4294966784 }
  0x25   :  { %403 = dma.done.wait [#allocation6], 512  }
  0x26   :  { %404 = vsyncadd [#allocation6], 4294966784  ;;  %v479_v0 = vld [vmem:[#allocation5] sm:$0xff]  ;;  %v481_v1 = vld [vmem:[#allocation5 + $0x8] sm:$0xff]  ;;  %v411_v13 = vmov 0.0   ;;  %vm412_vm0 = vmmov 0   ;;  %v86_v14 = vlaneseq }
  0x27   :  { %v52_v2 = vld [vmem:[#allocation2] sm:$0xff]  ;;  %v66_v3 = vadd.f32 %v481_v1, %v479_v0  ;;  %v53_v4 = vld [vmem:[#allocation2 + $0x8] sm:$0xff]  ;;  %v485_v5 = vld [vmem:[#allocation5 + $0x10] sm:$0xff]  ;;  %314 = vmatprep.subr.mxu0 %v411_v13  ;;  %316 = vmatprep.mubr.msk.f32.mxu0 %vm412_vm0, %v411_v13  ;;  %vm96_vm1 = vcmask 1041409   ;;  %vm98_vm2 = vcmask 64512   ;;  %vm184_vm3 = vcmask 1043456  }
  0x28   :  { %v487_v6 = vld [vmem:[#allocation5 + $0x18] sm:$0xff]  ;;  %v56_v7 = vadd.f32 %v53_v4, %v52_v2  ;;  %v54_v8 = vld [vmem:[#allocation2 + $0x10] sm:$0xff]  ;;  %v76_v12 = vld [vmem:[%s524_s2] sm:$0xff]  ;;  %319 = vmatprep.subr.mxu1 %v411_v13  ;;  %321 = vmatprep.mubr.msk.f32.mxu1 %vm412_vm0, %v411_v13  ;;  %v87_v17 = vand.u32 127, %v86_v14  ;;  %v89_v18 = vshrl.u32 %v86_v14, 7  ;;  %vm180_vm4 = vcmask 31744  }
  0x29   :  { %v55_v9 = vld [vmem:[#allocation2 + $0x18] sm:$0xff]  ;;  %67 = vadd.xlane.f32.xlu1 %v66_v3  ;;  %v69_v10 = vadd.f32 %v487_v6, %v485_v5  ;;  %315 = vmatpush3.msra.mxu0 %v76_v12  ;;  %v172_v29 = vld [vmem:[%s526_s4] sm:$0xf] }
  0x2a   :  { %57 = vadd.xlane.f32.xlu0 %v56_v7  ;;  %v59_v11 = vadd.f32 %v55_v9, %v54_v8  ;;  %v90_v22 = vsub.s32 %v87_v17, %v89_v18  ;;  %320 = vmatpush3.msk.msra.mxu1 %vm184_vm3, %v172_v29  ;;  %v304_v30 = vld [vmem:[%s525_s3] ss:$0 sm:$0xff]  ;;  %v273_v42 = vsub.s32 1, %v89_v18  ;;  %v266_v43 = vsub.s32 0, %v89_v18  ;;  %s413_s3 = smov [#allocation7]  }
  0x2b   :  { %v306_v35 = vld [vmem:[%s527_s5] ss:$0 sm:$0xff]  ;;  %s291_s4 = sshll.u32 %s413_s3, 4  ;;  %s292_s4 = int_to_ptr.vmem [resolvable:$true] %s291_s4 }
  0x2c   :  { %s379_s5 = scalar_lea.vmem %s292_s4, 512  ;;  %p384_p3 = scmp.lt.s32.totalorder %s292_s4, %s292_s4 }
  0x2d   :  { %70 = vadd.xlane.f32.xlu1 %v69_v10  ;;  %p380_p2 = scmp.ne.s32.totalorder %s292_s4, %s379_s5  ;;  %p385_p4 = scmp.lt.s32.totalorder %s379_s5, %s379_s5 }
  0x2e   :  { %60 = vadd.xlane.f32.xlu0 %v59_v11 }
  0x2f   :  { %p386_p5 = por %p385_p4, %p384_p3 }
  0x31   :  { %p387_p6 = pnand %p386_p5, %p380_p2 }
  0xb6   :  { %v68_v15 = vpop.xlane.xlu1 %67 }
  0xb7   :  { %v58_v16 = vpop.xlane.xlu0 %57 }
  0xb8   :  { %v72_v19 = vadd.f32 %v68_v15, %v58_v16 }
  0xba   :  { %v71_v20 = vpop.xlane.xlu1 %70  ;;  %v74_v23 = vmul.f32 0.00390625, %v72_v19 }
  0xbb   :  { %v61_v21 = vpop.xlane.xlu0 %60 }
  0xbc   :  { %v73_v24 = vadd.f32 %v71_v20, %v61_v21  ;;  %v91_v26 = vrot.slane %v74_v23, %v90_v22 }
  0xbe   :  { %v75_v25 = vmul.f32 0.00390625, %v73_v24 }
  0xc0   :  { %v95_v27 = vrot.slane %v75_v25, %v90_v22 }
  0xc2   :  { %v97_v28 = vsel %vm96_vm1, %v95_v27, %v91_v26 }
  0xc3   :  { %317 = vmatmul.mubr.msk.f32.vlgmr.msra.gmra.mrb[0].mxu0 %vm98_vm2, %v97_v28 }
 0x196   :  { %v167_v31 = vpop.f32.mrb[0].mxu0 }
 0x197   :  { %v168_v32 = vadd.f32 %v304_v30, %v167_v31  ;;  %v318_v33 = vpop.f32.mrb[1].mxu0 }
 0x199   :  { %v171_v34 = vmax.f32 %v168_v32, 0.0 }
 0x19b   :  { %322 = vmatmul.mubr.msk.f32.vlgmr.msra.gmra.mrb[0].mxu1 %vm180_vm4, %v171_v34 }
 0x26e   :  { %v254_v36 = vpop.f32.mrb[0].mxu1 }
 0x26f   :  { %v255_v37 = vadd.f32 %v306_v35, %v254_v36  ;;  %v323_v38 = vpop.f32.mrb[1].mxu1 }
 0x271   :  { %v309_v39 = vmul.f32 -1.442695, %v255_v37 }
 0x273   :  { %331 = vpow2.f32 %v309_v39 }
 0x27d   :  { %v332_v40 = vpop.eup %331 }
 0x27e   :  { %v261_v41 = vadd.f32 1.0, %v332_v40 }
 0x280   :  { %333 = vrcp.f32 %v261_v41 }
 0x28a   :  { %v334_v44 = vpop.eup %333 }
 0x28b   :  { %v274_v45 = vrot.slane %v334_v44, %v273_v42  ;;  %v267_v46 = vrot.slane %v334_v44, %v266_v43 }
 0x28d   :  { %276 = vbcast.lane.b32.xlu1 %v274_v45, 256  ;;  %269 = vbcast.lane.b32.xlu0 %v267_v46, 256 }
 0x2ff   :  { %v277_v47 = vpop.permute.xlu1 %276  ;;  %v270_v48 = vpop.permute.xlu0 %269 }
 0x300   :  { %v280_v49 = vmul.f32 %v277_v47, %v485_v5  ;;  %v281_v50 = vmul.f32 %v277_v47, %v487_v6  ;;  %v278_v51 = vmul.f32 %v270_v48, %v479_v0  ;;  %v279_v52 = vmul.f32 %v270_v48, %v481_v1 }
 0x302   :  { %284 = vst [vmem:[#allocation7 + $0x10] sm:$0xff] %v280_v49  ;;  %285 = vst [vmem:[#allocation7 + $0x18] sm:$0xff] %v281_v50 }
 0x303   :  { %282 = vst [vmem:[#allocation7] sm:$0xff] %v278_v51  ;;  %283 = vst [vmem:[#allocation7 + $0x8] sm:$0xff] %v279_v52 }
 0x304   :  { %390 = shalt.err (!%p387_p6)
}
 0x305   :  { %s391_s30 = scalar_lea.hbm %s528_s6, 512 }
 0x306   :  { %p392_p7 = scmp.ne.s32.totalorder %s528_s6, %s391_s30  ;;  %p395_p8 = scmp.lt.u32.totalorder %s391_s30, %s528_s6 }
 0x308   :  { %p397_p9 = pnand %p395_p8, %p392_p7 }
 0x30a   :  { %400 = shalt.err (!%p397_p9)
}
 0x30b   :  { %297 = dma.vmem_to_hbm [thread:$0]  %s292_s4, 512, %s528_s6, [#allocation4], %s408_s7, %s408_s7, %s409_s8  }
 0x30c   :  { %405 = dma.done.wait [#allocation4], 512  }
 0x30d   :  { %406 = vsyncadd [#allocation4], 4294966784 }
 0x30e   :  { %301 = vsyncpa [#allocation3], 1 }
 0x30f   :  { %302 = vsyncpa [#allocation6], 1 }
 0x310   :  { %303 = vsyncpa [#allocation4], 1 }

</bundles_post_ra>
